<compile_context>
chip_gen: v7x
topology: tpu7x:2x2x1
jax: 0.10.0
libtpu: 0.0.40
codegen_flags: <defaults>
</compile_context>

<pallas_src>
import jax
import jax.numpy as jnp
from jax import lax
from jax.experimental import pallas as pl
from jax.experimental.pallas import tpu as pltpu


# ----------------------------------------------------------------------------
# Spectral norm (parameter preprocessing, plain JAX glue)
# ----------------------------------------------------------------------------
def l2normalize(v, eps=1e-12):
    return v / (jnp.linalg.norm(v) + eps)


def spectral_norm_weight(w, u, v, power_iterations=1):
    """w: (Cout, Cin, KH, KW); u: (Cout,); v: (Cin*KH*KW,).

    Returns (w / sigma, u_new, v_new); u/v power iteration is done under
    stop_gradient to mirror PyTorch's no-grad buffer updates.
    """
    height = w.shape[0]
    w_mat = w.reshape(height, -1)
    w_det = lax.stop_gradient(w_mat)
    for _ in range(power_iterations):
        v = l2normalize(w_det.T @ u)
        u = l2normalize(w_det @ v)
    sigma = u @ (w_mat @ v)
    return w / sigma, u, v


# ----------------------------------------------------------------------------
# Helpers
# ----------------------------------------------------------------------------
def _round_up(x, m):
    return ((x + m - 1) // m) * m


def _pick_row_tile(oh, cap=64):
    """Largest divisor of OH that is <= cap (and leaves >=2 row blocks when
    possible, so the pipeline / megacore sharding has something to chew on)."""
    cap = max(1, min(oh, cap))
    if oh > 1:
        cap = min(cap, max(oh // 2, 1))
    for d in range(cap, 0, -1):
        if oh % d == 0:
            return d
    return 1


# ----------------------------------------------------------------------------
# Pallas kernel: conv2d (no bias) + LeakyReLU(0.2), one (batch, row-block)
# output tile per grid step, single deep-K matmul per tile.
# ----------------------------------------------------------------------------
def _make_conv_kernel(RT, OW, Cin_p, Cout_p, KH, KW, stride, dilation,
                      neg_slope):
    in_rows = (RT - 1) * stride + (KH - 1) * dilation + 1
    K = KH * KW * Cin_p

    def kernel(x_ref, w_ref, o_ref):
        # x_ref: (1, Hp, Wp, Cin_p)   full padded image for this batch element
        # w_ref: (KH*KW*Cin_p, Cout_p)
        # o_ref: (1, RT, OW, Cout_p)  lane-dense output row block
        r = pl.program_id(1)
        h_start = r * (RT * stride)
        if (RT * stride) % 8 == 0:
            h_start = pl.multiple_of(h_start, 8)

        # Only the rows needed by this row block (H is an untiled leading axis,
        # so the dynamic offset is just an address computation).
        xw = x_ref[0, pl.ds(h_start, in_rows), :, :]   # (in_rows, Wp, Cin_p)

        # im2col: gather the KH*KW taps and fold them into the K axis so the
        # MXU sees one deep contraction instead of KH*KW shallow ones.
        taps = []
        for kh in range(KH):
            for kw in range(KW):
                h0 = kh * dilation
                w0 = kw * dilation
                taps.append(lax.slice(
                    xw,
                    (h0, w0, 0),
                    (h0 + (RT - 1) * stride + 1,
                     w0 + (OW - 1) * stride + 1,
                     Cin_p),
                    (stride, stride, 1)))              # (RT, OW, Cin_p)
        patch = jnp.concatenate(taps, axis=-1)          # (RT, OW, K)
        patch = patch.reshape(RT * OW, K)

        acc = jnp.dot(patch, w_ref[...],
                      preferred_element_type=jnp.float32)   # (RT*OW, Cout_p)

        # LeakyReLU(0.2) in f32, cast only at the store.
        y = jnp.where(acc > 0, acc, neg_slope * acc)
        o_ref[0] = y.reshape(RT, OW, Cout_p).astype(o_ref.dtype)

    return kernel


# ----------------------------------------------------------------------------
# Public wrapper (NCHW in / NCHW out, PyTorch convention)
# ----------------------------------------------------------------------------
def conv2d_layer_forward(x_nchw, w_bar, u, v, *, stride=1, padding=0,
                         dilation=1, power_iterations=1, neg_slope=0.2,
                         compute_dtype=None):
    """Conv2dLayer.forward defaults (zero pad, SN conv no-bias, no norm, lrelu).

    x_nchw: (N, Cin, H, W)   w_bar: (Cout, Cin, KH, KW)
    Returns: (N, Cout, OH, OW)
    """
    N, Cin, H, W = x_nchw.shape
    Cout, _, KH, KW = w_bar.shape

    # SpectralNorm._update_u_v: normalize weight by leading singular value.
    w_sn, _, _ = spectral_norm_weight(w_bar, u, v, power_iterations)

    out_dtype = x_nchw.dtype
    mxu_dtype = compute_dtype if compute_dtype is not None else out_dtype

    # TODO(synk): for end-to-end dswn, keep activations NHWC between layers so
    # these two full-tensor HBM transposes disappear from the hot path.
    x = jnp.transpose(x_nchw, (0, 2, 3, 1))
    x = jnp.pad(x, ((0, 0), (padding, padding), (padding, padding), (0, 0)))
    Hp, Wp = H + 2 * padding, W + 2 * padding
    OH = (Hp - dilation * (KH - 1) - 1) // stride + 1
    OW = (Wp - dilation * (KW - 1) - 1) // stride + 1

    # Channel padding: Cout -> multiple of 128 (lane-dense output stores),
    # Cin -> multiple of 8 (sublane-friendly K chunks). Zero padding is exact:
    # padded Cin rows hit zero weights, padded Cout columns are sliced off.
    Cout_p = _round_up(Cout, 128)
    Cin_p = _round_up(Cin, 8)

    x = jnp.pad(x, ((0, 0), (0, 0), (0, 0), (0, Cin_p - Cin))).astype(mxu_dtype)

    # OIHW -> (KH, KW, Cin, Cout) -> zero-pad -> (KH*KW*Cin_p, Cout_p),
    # tap-major / cin-minor, matching the im2col patch built in the kernel.
    w_hwio = jnp.transpose(w_sn, (2, 3, 1, 0))
    w_hwio = jnp.pad(w_hwio,
                     ((0, 0), (0, 0), (0, Cin_p - Cin), (0, Cout_p - Cout)))
    w2d = w_hwio.reshape(KH * KW * Cin_p, Cout_p).astype(mxu_dtype)

    RT = _pick_row_tile(OH)
    n_rb = OH // RT

    kernel = _make_conv_kernel(RT, OW, Cin_p, Cout_p, KH, KW, stride,
                               dilation, neg_slope)

    flops = 2 * N * OH * OW * Cout * Cin * KH * KW
    bytes_accessed = (x.size * x.dtype.itemsize
                      + w2d.size * w2d.dtype.itemsize
                      + N * OH * OW * Cout_p * jnp.dtype(out_dtype).itemsize)
    cost = pl.CostEstimate(flops=flops, transcendentals=0,
                           bytes_accessed=bytes_accessed)

    out_nhwc = pl.pallas_call(
        kernel,
        out_shape=jax.ShapeDtypeStruct((N, OH, OW, Cout_p), out_dtype),
        grid_spec=pltpu.PrefetchScalarGridSpec(
            num_scalar_prefetch=0,
            grid=(N, n_rb),
            in_specs=[
                # Full padded image per batch element; block index is constant
                # along the row-block axis, so it is DMA'd once per n.
                # TODO(synk): for very large images on v7x (64 MiB VMEM),
                # switch to halo'd row-block input DMA instead of full-image
                # staging.
                pl.BlockSpec((1, Hp, Wp, Cin_p), lambda n, r: (n, 0, 0, 0)),
                pl.BlockSpec((KH * KW * Cin_p, Cout_p), lambda n, r: (0, 0)),
            ],
            out_specs=pl.BlockSpec((1, RT, OW, Cout_p),
                                   lambda n, r: (n, r, 0, 0)),
        ),
        compiler_params=pltpu.CompilerParams(
            dimension_semantics=("parallel", "parallel"),
            vmem_limit_bytes=48 * 1024 * 1024,
        ),
        cost_estimate=cost,
    )(x, w2d)

    # Drop the Cout lane padding; NHWC -> NCHW to match the PyTorch module.
    out_nhwc = out_nhwc[..., :Cout]
    return jnp.transpose(out_nhwc, (0, 3, 1, 2))


# ----------------------------------------------------------------------------
# Demo
# ----------------------------------------------------------------------------
if __name__ == "__main__":
    key = jax.random.PRNGKey(0)
    k_x, k_w, k_u, k_v = jax.random.split(key, 4)

    # Small shapes consistent with the module: Conv2dLayer(4, 8, 3, padding=1)
    N, Cin, H, W = 2, 4, 16, 16
    Cout, KH, KW = 8, 3, 3
    stride, padding, dilation = 1, 1, 1

    x = jax.random.normal(k_x, (N, Cin, H, W), dtype=jnp.float32)

    # Deterministic parameter init (conv weight + spectral-norm u/v vectors).
    w_bar = jax.random.normal(k_w, (Cout, Cin, KH, KW), dtype=jnp.float32) * 0.1
    u = l2normalize(jax.random.normal(k_u, (Cout,), dtype=jnp.float32))
    v = l2normalize(jax.random.normal(k_v, (Cin * KH * KW,), dtype=jnp.float32))

    out = conv2d_layer_forward(x, w_bar, u, v, stride=stride,
                               padding=padding, dilation=dilation)
    out = jax.block_until_ready(out)

    # Silent sanity check against XLA's conv (same SN weight + lrelu).
    w_sn, _, _ = spectral_norm_weight(w_bar, u, v)
    ref = jax.lax.conv_general_dilated(
        x, w_sn, window_strides=(stride, stride),
        padding=[(padding, padding), (padding, padding)],
        rhs_dilation=(dilation, dilation),
        dimension_numbers=("NCHW", "OIHW", "NCHW"))
    ref = jnp.where(ref > 0, ref, 0.2 * ref)
    assert out.shape == (N, Cout, H, W)
    assert jnp.allclose(out, ref, atol=1e-4, rtol=1e-4)

    print("KERNEL_OK")
</pallas_src>

<mosaic_0001>
module attributes {stable_mosaic.version = 11 : i64} {
  func.func @kernel(%arg0: i32, %arg1: i32, %arg2: memref<1x18x18x8xf32, #tpu.memory_space<vmem>>, %arg3: memref<72x128xf32, #tpu.memory_space<vmem>>, %arg4: memref<1x8x16x128xf32, #tpu.memory_space<vmem>>) attributes {dimension_semantics = [#tpu.dimension_semantics<parallel>, #tpu.dimension_semantics<parallel>], iteration_bounds = array<i64: 2, 2>, scalar_prefetch = 0 : i64, scratch_operands = 0 : i64, tpu.core_type = #tpu.core_type<tc>, window_params = [{transform_indices = @transform_0, window_bounds = array<i64: 1, 18, 18, 8>}, {pipeline_mode = #tpu.pipeline_mode<synchronous>, transform_indices = @transform_1, window_bounds = array<i64: 72, 128>}, {transform_indices = @transform_2, window_bounds = array<i64: 1, 8, 16, 128>}]} {
    %c8_i32 = arith.constant 8 : i32
    %0 = arith.muli %arg1, %c8_i32 : i32
    %1 = tpu.assume_multiple %0, 8 : i32
    %c0 = arith.constant 0 : index
    %2 = arith.index_cast %1 : i32 to index
    %c0_0 = arith.constant 0 : index
    %c0_1 = arith.constant 0 : index
    %3 = vector.load %arg2[%c0, %2, %c0_0, %c0_1] : memref<1x18x18x8xf32, #tpu.memory_space<vmem>>, vector<1x10x18x8xf32>
    %4 = vector.shape_cast %3 : vector<1x10x18x8xf32> to vector<10x18x8xf32>
    %5 = vector.extract_strided_slice %4 {offsets = [0, 0, 0], sizes = [8, 16, 8], strides = [1, 1, 1]} : vector<10x18x8xf32> to vector<8x16x8xf32>
    %6 = vector.extract_strided_slice %4 {offsets = [0, 1, 0], sizes = [8, 16, 8], strides = [1, 1, 1]} : vector<10x18x8xf32> to vector<8x16x8xf32>
    %7 = vector.extract_strided_slice %4 {offsets = [0, 2, 0], sizes = [8, 16, 8], strides = [1, 1, 1]} : vector<10x18x8xf32> to vector<8x16x8xf32>
    %8 = vector.extract_strided_slice %4 {offsets = [1, 0, 0], sizes = [8, 16, 8], strides = [1, 1, 1]} : vector<10x18x8xf32> to vector<8x16x8xf32>
    %9 = vector.extract_strided_slice %4 {offsets = [1, 1, 0], sizes = [8, 16, 8], strides = [1, 1, 1]} : vector<10x18x8xf32> to vector<8x16x8xf32>
    %10 = vector.extract_strided_slice %4 {offsets = [1, 2, 0], sizes = [8, 16, 8], strides = [1, 1, 1]} : vector<10x18x8xf32> to vector<8x16x8xf32>
    %11 = vector.extract_strided_slice %4 {offsets = [2, 0, 0], sizes = [8, 16, 8], strides = [1, 1, 1]} : vector<10x18x8xf32> to vector<8x16x8xf32>
    %12 = vector.extract_strided_slice %4 {offsets = [2, 1, 0], sizes = [8, 16, 8], strides = [1, 1, 1]} : vector<10x18x8xf32> to vector<8x16x8xf32>
    %13 = vector.extract_strided_slice %4 {offsets = [2, 2, 0], sizes = [8, 16, 8], strides = [1, 1, 1]} : vector<10x18x8xf32> to vector<8x16x8xf32>
    %14 = tpu.concatenate %5, %6, %7, %8, %9, %10, %11, %12, %13 in 2 : vector<8x16x8xf32>, vector<8x16x8xf32>, vector<8x16x8xf32>, vector<8x16x8xf32>, vector<8x16x8xf32>, vector<8x16x8xf32>, vector<8x16x8xf32>, vector<8x16x8xf32>, vector<8x16x8xf32> -> vector<8x16x72xf32>
    %15 = vector.shape_cast %14 : vector<8x16x72xf32> to vector<128x72xf32>
    %c0_2 = arith.constant 0 : index
    %c0_3 = arith.constant 0 : index
    %16 = vector.load %arg3[%c0_2, %c0_3] : memref<72x128xf32, #tpu.memory_space<vmem>>, vector<72x128xf32>
    %cst = arith.constant dense<0.000000e+00> : vector<128x128xf32>
    %17 = tpu.matmul %15, %16, %cst {dimension_numbers = #tpu.dot_dimension_numbers<[1], [0], [0], [1], [0, 0, 1, 1], [], []>} : vector<128x72xf32>, vector<72x128xf32>, vector<128x128xf32> -> vector<128x128xf32>
    %cst_4 = arith.constant 0.000000e+00 : f32
    %18 = vector.broadcast %cst_4 : f32 to vector<128x128xf32>
    %19 = arith.cmpf ogt, %17, %18 : vector<128x128xf32>
    %cst_5 = arith.constant 2.000000e-01 : f32
    %20 = vector.broadcast %cst_5 : f32 to vector<128x128xf32>
    %21 = arith.mulf %20, %17 : vector<128x128xf32>
    %22 = arith.select %19, %17, %21 : vector<128x128xi1>, vector<128x128xf32>
    %23 = vector.shape_cast %22 : vector<128x128xf32> to vector<8x16x128xf32>
    %c0_6 = arith.constant 0 : index
    %c0_7 = arith.constant 0 : index
    %c0_8 = arith.constant 0 : index
    %c0_9 = arith.constant 0 : index
    %24 = vector.load %arg4[%c0_6, %c0_7, %c0_8, %c0_9] : memref<1x8x16x128xf32, #tpu.memory_space<vmem>>, vector<1x8x16x128xf32>
    %25 = vector.shape_cast %24 : vector<1x8x16x128xf32> to vector<8x16x128xf32>
    %26 = vector.shape_cast %23 : vector<8x16x128xf32> to vector<1x8x16x128xf32>
    tpu.vector_store %arg4[%c0_6, %c0_7, %c0_8, %c0_9], %26 {strides = array<i32>} : memref<1x8x16x128xf32, #tpu.memory_space<vmem>>, vector<1x8x16x128xf32>,
    return
  }
  func.func @transform_0(%arg0: i32, %arg1: i32) -> (i32, i32, i32, i32) {
    %c0_i32 = arith.constant 0 : i32
    %c0_i32_0 = arith.constant 0 : i32
    %c0_i32_1 = arith.constant 0 : i32
    %c0_i32_2 = arith.constant 0 : i32
    return %arg0, %c0_i32, %c0_i32_0, %c0_i32_1 : i32, i32, i32, i32
  }
  func.func @transform_1(%arg0: i32, %arg1: i32) -> (i32, i32) {
    %c0_i32 = arith.constant 0 : i32
    %c0_i32_0 = arith.constant 0 : i32
    %c0_i32_1 = arith.constant 0 : i32
    return %c0_i32, %c0_i32_0 : i32, i32
  }
  func.func @transform_2(%arg0: i32, %arg1: i32) -> (i32, i32, i32, i32) {
    %c0_i32 = arith.constant 0 : i32
    %c0_i32_0 = arith.constant 0 : i32
    %c0_i32_1 = arith.constant 0 : i32
    return %arg0, %arg1, %c0_i32, %c0_i32_0 : i32, i32, i32, i32
  }
}

</mosaic_0001>

<bundles_post_ra>
// kernel: tpu_custom_call.1
= control target key start
LH: loop header
LB: loop body
LE: loop exit
PB: predicated region body
PF: predicated region fallthrough
CT: control target
= control target key end

     0   :  { %7 = vsyncpa [#allocation3], 0  ;;  %s2350_s0 = inlined_call_operand.vmem [shape: f32[2,18,18,8], index: 0, kind: input, shape index: {}]   ;;  %s2351_s1 = inlined_call_operand.vmem [shape: f32[72,128], index: 1, kind: input, shape index: {}]   ;;  %s2352_s2 = inlined_call_operand.hbm [shape: f32[2,16,16,128], index: 2, kind: output, shape index: {}]  }
   0x1   :  { %9 = vsyncpa [#allocation3 + $0x1], 0  ;;  %s1532_s9 = smov 0   ;;  %s1534_s10 = smov 0  }
   0x2   :  { %s1536_s11 = smov 0   ;;  %s1538_s12 = smov 0  }
   0x3   :  { %s1540_s13 = smov 0   ;;  %s1542_s14 = smov 0  }
   0x4   :  { %s1544_s15 = smov 0   ;;  %s1546_s16 = smov 0  }
   0x5 LB: > { %s1204_s17 = sadd.s32 4294967295, %s1505_s16   ;;  %s1205_s18 = sadd.s32 4294967294, %s1505_s16   ;;  %s1505_s16 = sphi %s1546_s16, %s15_s16   ;;  %s1501_s15 = sphi %s1544_s15, %s2388_s15   ;;  %s1497_s14 = sphi %s1542_s14, %s2387_s14   ;;  %s1493_s13 = sphi %s1540_s13, %s2386_s13   ;;  %s1489_s12 = sphi %s1538_s12, %s2385_s12   ;;  %s1485_s11 = sphi %s1536_s11, %s2384_s11   ;;  %s1481_s10 = sphi %s1534_s10, %s2383_s10   ;;  %s1477_s9 = sphi %s1532_s9, %s2382_s9  }
   0x6   : > { %s24_s19 = sadd.s32 1, %s1497_s14  ;;  %s27_s20 = sadd.s32 1, %s1501_s15 }
   0x7   : > { %p25_p0 = scmp.ge.s32.totalorder %s24_s19, 2  ;;  %p93_p1 = scmp.ne.s32.totalorder %s1485_s11, %s1481_s10 }
   0x8   : > { %p94_p2 = scmp.eq.s32.totalorder %s1204_s17, 3  ;;  %p99_p5 = scmp.ne.s32.totalorder %s1481_s10, %s1477_s9 }
   0x9   : > { %s2390_s19 = smov (%p25_p0, %s24_s19), 0  ;;  %s2392_s20 = smov (!%p25_p0, %s27_s20), %s1501_s15 }
   0xa   : > { %s79_s21 = ssub.s32 %s1497_s14, %s2390_s19  ;;  %p1583_p3 = por %p94_p2, %p93_p1 }
   0xb   : > { %p29_p4 = scmp.ge.s32.totalorder %s2392_s20, 2  ;;  %p100_p6 = scmp.eq.s32.totalorder %s1205_s18, 3 }
   0xc   : > { %p1208_p7 = scmp.ge.s32.totalorder %s1505_s16, 1  ;;  %p129_p9 = scmp.lt.s32.totalorder %s1505_s16, 5 }
   0xd   : > { %s2394_s20 = smov (%p29_p4, %s2392_s20), 0  ;;  %p1592_p8 = por %p100_p6, %p99_p5 }
   0xe   : > { %s78_s24 = ssub.s32 %s1501_s15, %s2394_s20  ;;  %s83_s25 = sadd.s32 1, %s1485_s11 }
   0xf   : > { %s80_s26 = sor.u32 %s79_s21, %s78_s24  ;;  %p130_p10 = pnand %p1208_p7, %p129_p9 }
  0x10   : > { %p81_p11 = scmp.eq.s32.totalorder %s80_s26, 0 }
  0x11   : > { %133 = sbr.rel (%p130_p10) target bundleno = 636 (0x27c), region = 28 }
  0x12   : > { %s1601_s27 = scalar_select %p81_p11, %s1485_s11, %s83_s25  }
  0x18   : > { %p151_p12 = scmp.lt.s32.totalorder %s1493_s13, 1  ;;  %s1212_s29 = smul.u32 192, %s1489_s12  ;;  %vm214_vm0 = vcmask 1046528   ;;  %vm303_vm1 = vcmask 1045504   ;;  %v842_v62 = vld [vmem:[%s2351_s1] sm:$0xff]  ;;  %v843_v63 = vld [vmem:[%s2351_s1 + $0x8] sm:$0xff] }
  0x19   : > { %s1507_s7 = smov 8   ;;  %s1508_s8 = smov 16   ;;  %vm706_vm2 = vcmask 64512   ;;  %vm723_vm3 = vcmask 130048   ;;  %vm740_vm4 = vcmask 195584   ;;  %vm757_vm5 = vcmask 261120  }
  0x1a   : > { %s152_s28 = scalar_select %p151_p12, %s1493_s13, 1  ;;  %vm774_vm6 = vcmask 326656   ;;  %vm791_vm7 = vcmask 392192   ;;  %vm808_vm8 = vcmask 457728   ;;  %vm825_vm9 = vcmask 523264  }
  0x1b   : > { %s1509_s17 = smov 24   ;;  %s1510_s18 = smov 32   ;;  %vm851_vm10 = vcmask 588800  }
  0x1c   : > { %s1330_s30 = smul.u32 432, %s152_s28  ;;  %s1511_s21 = smov 40  }
  0x1d   : > { %s1512_s24 = smov 48   ;;  %s1514_s28 = smov 64  }
  0x1e   : > { %s155_s5 = scalar_lea.vmem %s2350_s0, %s1330_s30  ;;  %s1513_s30 = smov 56  }
  0x1f   : > { %s1609_s6 = scalar_lea.vmem %s155_s5, %s1212_s29 }
  0x20   : > { %v1612_v0 = vld [vmem:[%s1609_s6 + $0x8] sm:$0xff]  ;;  %v162_v1 = vld [vmem:[%s1609_s6 + $0x10] sm:$0x3]  ;;  %v1616_v2 = vld [vmem:[%s1609_s6] sm:$0xff] }
  0x21   : > { %v216_v3 = vrot.slane %v1612_v0, 1  ;;  %v218_v4 = vrot.slane %v162_v1, 1  ;;  %v215_v5 = vrot.slane %v1616_v2, 1  ;;  %v1621_v6 = vld [vmem:[%s1609_s6 + $0x68] sm:$0xff]  ;;  %v174_v7 = vld [vmem:[%s1609_s6 + $0x70] sm:$0x3] }
  0x22   : > { %v236_v8 = vrot.slane %v1621_v6, 1  ;;  %v238_v9 = vrot.slane %v174_v7, 1  ;;  %v1626_v10 = vld [vmem:[%s1609_s6 + $0x60] sm:$0xff]  ;;  %v325_v14 = vrot.slane %v1621_v6, 2  ;;  %v304_v15 = vrot.slane %v1616_v2, 2  ;;  %v1662_v26 = vld [vmem:[%s1609_s6 + $0x78] sm:$0xff] }
  0x23   : > { %v219_v11 = vsel %vm214_vm0, %v216_v3, %v218_v4  ;;  %v217_v12 = vsel %vm214_vm0, %v215_v5, %v216_v3  ;;  %v235_v13 = vrot.slane %v1626_v10, 1  ;;  %v324_v18 = vrot.slane %v1626_v10, 2  ;;  %v1665_v27 = vld [vmem:[%s1609_s6 + $0x18] sm:$0xff]  ;;  %v1668_v28 = vld [vmem:[%s1609_s6 + $0x80] sm:$0xff]  ;;  %v177_v36 = vld [vmem:[%s1609_s6 + $0x88] sm:$0x3] }
  0x24   : > { %257 = vrot.lane.b32.xlu1 %v219_v11, %s1507_s7  ;;  %255 = vrot.lane.b32.xlu0 %v217_v12, %s1507_s7  ;;  %v1636_v16 = vsel %vm214_vm0, %v236_v8, %v238_v9  ;;  %v305_v19 = vrot.slane %v1612_v0, 2  ;;  %v327_v22 = vrot.slane %v174_v7, 2  ;;  %v307_v23 = vrot.slane %v162_v1, 2  ;;  %v1671_v29 = vld [vmem:[%s1609_s6 + $0x20] sm:$0xff]  ;;  %v165_v37 = vld [vmem:[%s1609_s6 + $0x28] sm:$0x3] }
  0x25   : > { %v1639_v17 = vsel %vm214_vm0, %v235_v13, %v236_v8  ;;  %v1648_v20 = vsel %vm303_vm1, %v324_v18, %v325_v14  ;;  %v240_v30 = vrot.slane %v1662_v26, 1  ;;  %v241_v31 = vrot.slane %v1668_v28, 1  ;;  %v1729_v52 = vld [vmem:[%s1609_s6 + $0x90] sm:$0xff]  ;;  %v1742_v54 = vld [vmem:[%s1609_s6 + $0x98] sm:$0xff]  ;;  %v180_v3 = vld [vmem:[%s1609_s6 + $0xa0] sm:$0x3] }
  0x26   : > { %v306_v21 = vsel %vm303_vm1, %v304_v15, %v305_v19  ;;  %v1655_v24 = vsel %vm303_vm1, %v325_v14, %v327_v22  ;;  %v308_v25 = vsel %vm303_vm1, %v305_v19, %v307_v23  ;;  %v220_v32 = vrot.slane %v1665_v27, 1  ;;  %v1732_v53 = vld [vmem:[%s1609_s6 + $0x30] sm:$0xff]  ;;  %v1745_v55 = vld [vmem:[%s1609_s6 + $0x38] sm:$0xff]  ;;  %v168_v4 = vld [vmem:[%s1609_s6 + $0x40] sm:$0x3] }
  0x27   : > { %v221_v33 = vrot.slane %v1671_v29, 1  ;;  %v1686_v34 = vsel %vm214_vm0, %v240_v30, %v241_v31  ;;  %v243_v38 = vrot.slane %v177_v36, 1  ;;  %v223_v39 = vrot.slane %v165_v37, 1  ;;  %2368 = vst [vmem:[#allocation9_spill] sm:$0xff] %v1745_v55  ;;  %v844_v5 = vld [vmem:[%s2351_s1 + $0x10] sm:$0xff]  ;;  %v845_v7 = vld [vmem:[%s2351_s1 + $0x18] sm:$0xff] }
  0x28   : > { %273 = vrot.lane.b32.xlu1 %v1636_v16, %s1507_s7  ;;  %271 = vrot.lane.b32.xlu0 %v1639_v17, %s1507_s7  ;;  %2364 = vst [vmem:[#allocation5_spill] sm:$0xff] %v1686_v34  ;;  %v329_v40 = vrot.slane %v1662_v26, 2  ;;  %v330_v41 = vrot.slane %v1668_v28, 2  ;;  %v309_v44 = vrot.slane %v1665_v27, 2  ;;  %v310_v45 = vrot.slane %v1671_v29, 2  ;;  %v846_v15 = vld [vmem:[%s2351_s1 + $0x20] sm:$0xff] }
  0x29   : > { %v222_v35 = vsel %vm214_vm0, %v220_v32, %v221_v33  ;;  %v1700_v42 = vsel %vm214_vm0, %v241_v31, %v243_v38  ;;  %v224_v43 = vsel %vm214_vm0, %v221_v33, %v223_v39  ;;  %v332_v48 = vrot.slane %v177_v36, 2  ;;  %v847_v18 = vld [vmem:[%s2351_s1 + $0x28] sm:$0xff]  ;;  %v849_v30 = vld [vmem:[%s2351_s1 + $0x38] sm:$0xff] }
  0x2a   : > { %2365 = vst [vmem:[#allocation6_spill] sm:$0xff] %v1700_v42  ;;  %v1709_v46 = vsel %vm303_vm1, %v329_v40, %v330_v41  ;;  %v311_v47 = vsel %vm303_vm1, %v309_v44, %v310_v45  ;;  %v312_v49 = vrot.slane %v165_v37, 2  ;;  %v245_v56 = vrot.slane %v1729_v52, 1  ;;  %v1827_v40 = vld [vmem:[%s1609_s6 + $0xa8] sm:$0xff] }
  0x2b   : > { %2366 = vst [vmem:[#allocation7_spill] sm:$0xff] %v1709_v46  ;;  %v1722_v50 = vsel %vm303_vm1, %v330_v41, %v332_v48  ;;  %v246_v57 = vrot.slane %v1742_v54, 1  ;;  %v225_v58 = vrot.slane %v1732_v53, 1  ;;  %v226_v59 = vrot.slane %v1745_v55, 1  ;;  %2369 = vst [vmem:[#allocation10_spill] sm:$0xff] %v1827_v40  ;;  %v1830_v41 = vld [vmem:[%s1609_s6 + $0x48] sm:$0xff] }
  0x2c   : > { %360 = vrot.lane.b32.xlu1 %v1648_v20, %s1508_s8  ;;  %344 = vrot.lane.b32.xlu0 %v306_v21, %s1508_s8  ;;  %2367 = vst [vmem:[#allocation8_spill] sm:$0xff] %v1722_v50  ;;  %v313_v51 = vsel %vm303_vm1, %v310_v45, %v312_v49  ;;  %v1304_v1 = vpack.c.bf16 %v843_v63, %v842_v62  ;;  %v248_v8 = vrot.slane %v180_v3, 1  ;;  %v228_v9 = vrot.slane %v168_v4, 1 }
  0x2d   : > { %v247_v60 = vsel %vm214_vm0, %v245_v56, %v246_v57  ;;  %v227_v61 = vsel %vm214_vm0, %v225_v58, %v226_v59  ;;  %v1308_v11 = vpack.c.bf16 %v845_v7, %v844_v5  ;;  %v334_v12 = vrot.slane %v1729_v52, 2  ;;  %2370 = vst [vmem:[#allocation11_spill] sm:$0xff] %v1830_v41  ;;  %v1854_v56 = vld [vmem:[%s1609_s6 + $0x50] sm:$0xff]  ;;  %v183_v5 = vld [vmem:[%s1609_s6 + $0xb8] sm:$0x3] }
  0x2e   : > { %1305 = vmatprep.subr.bf16.mxu0 %v1304_v1  ;;  %1320 = vmatprep.subr.bf16.mxu1 %v1304_v1  ;;  %v335_v13 = vrot.slane %v1742_v54, 2  ;;  %v314_v14 = vrot.slane %v1732_v53, 2  ;;  %v249_v19 = vsel %vm214_vm0, %v246_v57, %v248_v8  ;;  %v229_v21 = vsel %vm214_vm0, %v226_v59, %v228_v9  ;;  %2372 = vst [vmem:[#allocation13_spill] sm:$0xff] %v1854_v56  ;;  %v171_v7 = vld [vmem:[%s1609_s6 + $0x58] sm:$0x3] }
  0x2f   : > { %1307 = vmatpush3.bf16.msra.mxu0 %v1304_v1  ;;  %1325 = vmatpush3.bf16.msra.mxu1 %v1304_v1  ;;  %v315_v22 = vrot.slane %v1745_v55, 2  ;;  %v1312_v23 = vpack.c.bf16 %v847_v18, %v846_v15  ;;  %v337_v36 = vrot.slane %v180_v3, 2  ;;  %v317_v37 = vrot.slane %v168_v4, 2 }
  0x30   : > { %362 = vrot.lane.b32.xlu1 %v1655_v24, %s1508_s8  ;;  %346 = vrot.lane.b32.xlu0 %v308_v25, %s1508_s8  ;;  %v848_v25 = vld [vmem:[%s2351_s1 + $0x30] sm:$0xff]  ;;  %v336_v31 = vsel %vm303_vm1, %v334_v12, %v335_v13  ;;  %v250_v57 = vrot.slane %v1827_v40, 1  ;;  %v230_v59 = vrot.slane %v1830_v41, 1  ;;  %v233_v12 = vrot.slane %v171_v7, 1 }
  0x31   : > { %1309 = vmatprep.subr.bf16.mxu0 %v1308_v11  ;;  %1321 = vmatprep.subr.bf16.mxu1 %v1308_v11  ;;  %v316_v32 = vsel %vm303_vm1, %v314_v14, %v315_v22  ;;  %v1316_v33 = vpack.c.bf16 %v849_v30, %v848_v25  ;;  %v338_v38 = vsel %vm303_vm1, %v335_v13, %v337_v36 }
  0x32   : > { %v318_v39 = vsel %vm303_vm1, %v315_v22, %v317_v37  ;;  %v319_v22 = vrot.slane %v1830_v41, 2 }
  0x33   : > { %1311 = vmatpush3.bf16.msra.mxu0 %v1308_v11  ;;  %1326 = vmatpush3.bf16.msra.mxu1 %v1308_v11  ;;  %v253_v11 = vrot.slane %v183_v5, 1 }
  0x34   : > { %410 = vrot.lane.b32.xlu1 %v1662_v26, %s1509_s17  ;;  %394 = vrot.lane.b32.xlu0 %v1665_v27, %s1509_s17 }
  0x35   : > { %1313 = vmatprep.subr.bf16.mxu0 %v1312_v23  ;;  %1322 = vmatprep.subr.bf16.mxu1 %v1312_v23 }
  0x37   : > { %1315 = vmatpush3.bf16.msra.mxu0 %v1312_v23  ;;  %1327 = vmatpush3.bf16.msra.mxu1 %v1312_v23  ;;  %v320_v23 = vrot.slane %v1854_v56, 2 }
  0x38   : > { %412 = vrot.lane.b32.xlu1 %v1668_v28, %s1509_s17  ;;  %396 = vrot.lane.b32.xlu0 %v1671_v29, %s1509_s17 }
  0x39   : > { %1317 = vmatprep.subr.bf16.mxu0 %v1316_v33  ;;  %1323 = vmatprep.subr.bf16.mxu1 %v1316_v33 }
  0x3b   : > { %1319 = vmatpush3.bf16.msra.mxu0 %v1316_v33  ;;  %1328 = vmatpush3.bf16.msra.mxu1 %v1316_v33 }
  0x3c   : > { %464 = vrot.lane.b32.xlu1 %v1686_v34, %s1510_s18  ;;  %448 = vrot.lane.b32.xlu0 %v222_v35, %s1510_s18 }
  0x40   : > { %275 = vrot.lane.b32.xlu1 %v1686_v34, %s1507_s7  ;;  %259 = vrot.lane.b32.xlu0 %v222_v35, %s1507_s7  ;;  %v850_v35 = vld [vmem:[%s2351_s1 + $0x40] sm:$0xff] }
  0x41   : > { %1278 = vmatprep.subr.mxu0 %v850_v35  ;;  %1324 = vmatprep.subr.mxu1 %v850_v35 }
  0x42   : > { %1279 = vmatpush3.msra.mxu0 %v850_v35  ;;  %1329 = vmatpush3.msra.mxu1 %v850_v35 }
  0x44   : > { %466 = vrot.lane.b32.xlu1 %v1700_v42, %s1510_s18  ;;  %450 = vrot.lane.b32.xlu0 %v224_v43, %s1510_s18 }
  0x48   : > { %517 = vrot.lane.b32.xlu1 %v1709_v46, %s1511_s21  ;;  %501 = vrot.lane.b32.xlu0 %v311_v47, %s1511_s21 }
  0x4c   : > { %277 = vrot.lane.b32.xlu1 %v1700_v42, %s1507_s7  ;;  %261 = vrot.lane.b32.xlu0 %v224_v43, %s1507_s7 }
  0x50   : > { %364 = vrot.lane.b32.xlu1 %v1709_v46, %s1508_s8  ;;  %348 = vrot.lane.b32.xlu0 %v311_v47, %s1508_s8 }
  0x54   : > { %519 = vrot.lane.b32.xlu1 %v1722_v50, %s1511_s21  ;;  %503 = vrot.lane.b32.xlu0 %v313_v51, %s1511_s21 }
  0x58   : > { %567 = vrot.lane.b32.xlu1 %v1729_v52, %s1512_s24  ;;  %551 = vrot.lane.b32.xlu0 %v1732_v53, %s1512_s24 }
  0x5c   : > { %366 = vrot.lane.b32.xlu1 %v1722_v50, %s1508_s8  ;;  %350 = vrot.lane.b32.xlu0 %v313_v51, %s1508_s8  ;;  %v1851_v51 = vld [vmem:[%s1609_s6 + $0xb0] sm:$0xff] }
  0x5d   : > { %2371 = vst [vmem:[#allocation12_spill] sm:$0xff] %v1851_v51  ;;  %v251_v58 = vrot.slane %v1851_v51, 1 }
  0x5f   : > { %v252_v63 = vsel %vm214_vm0, %v250_v57, %v251_v58  ;;  %v254_v15 = vsel %vm214_vm0, %v251_v58, %v253_v11  ;;  %v342_v57 = vrot.slane %v183_v5, 2  ;;  %v322_v58 = vrot.slane %v171_v7, 2 }
  0x60   : > { %414 = vrot.lane.b32.xlu1 %v1729_v52, %s1509_s17  ;;  %398 = vrot.lane.b32.xlu0 %v1732_v53, %s1509_s17 }
  0x64   : > { %569 = vrot.lane.b32.xlu1 %v1742_v54, %s1512_s24  ;;  %553 = vrot.lane.b32.xlu0 %v1745_v55, %s1512_s24 }
  0x68   : > { %621 = vrot.lane.b32.xlu1 %v247_v60, %s1513_s30  ;;  %605 = vrot.lane.b32.xlu0 %v227_v61, %s1513_s30 }
  0x6c   : > { %416 = vrot.lane.b32.xlu1 %v1742_v54, %s1509_s17  ;;  %400 = vrot.lane.b32.xlu0 %v1745_v55, %s1509_s17 }
  0x70   : > { %468 = vrot.lane.b32.xlu1 %v247_v60, %s1510_s18  ;;  %452 = vrot.lane.b32.xlu0 %v227_v61, %s1510_s18 }
  0x74   : > { %623 = vrot.lane.b32.xlu1 %v249_v19, %s1513_s30  ;;  %607 = vrot.lane.b32.xlu0 %v229_v21, %s1513_s30 }
  0x78   : > { %674 = vrot.lane.b32.xlu1 %v336_v31, %s1514_s28  ;;  %658 = vrot.lane.b32.xlu0 %v316_v32, %s1514_s28 }
  0x7c   : > { %279 = vrot.lane.b32.xlu1 %v247_v60, %s1507_s7  ;;  %263 = vrot.lane.b32.xlu0 %v227_v61, %s1507_s7  ;;  %v231_v60 = vrot.slane %v1854_v56, 1 }
  0x7e   : > { %v232_v1 = vsel %vm214_vm0, %v230_v59, %v231_v60  ;;  %v234_v18 = vsel %vm214_vm0, %v231_v60, %v233_v12 }
  0x80   : > { %470 = vrot.lane.b32.xlu1 %v249_v19, %s1510_s18  ;;  %454 = vrot.lane.b32.xlu0 %v229_v21, %s1510_s18 }
  0x84   : > { %521 = vrot.lane.b32.xlu1 %v336_v31, %s1511_s21  ;;  %505 = vrot.lane.b32.xlu0 %v316_v32, %s1511_s21 }
  0x88   : > { %676 = vrot.lane.b32.xlu1 %v338_v38, %s1514_s28  ;;  %660 = vrot.lane.b32.xlu0 %v318_v39, %s1514_s28 }
  0x8c   : > { %281 = vrot.lane.b32.xlu1 %v249_v19, %s1507_s7  ;;  %265 = vrot.lane.b32.xlu0 %v229_v21, %s1507_s7  ;;  %v339_v19 = vrot.slane %v1827_v40, 2  ;;  %v340_v21 = vrot.slane %v1851_v51, 2 }
  0x90   : > { %368 = vrot.lane.b32.xlu1 %v336_v31, %s1508_s8  ;;  %352 = vrot.lane.b32.xlu0 %v316_v32, %s1508_s8  ;;  %v341_v31 = vsel %vm303_vm1, %v339_v19, %v340_v21  ;;  %v321_v32 = vsel %vm303_vm1, %v319_v22, %v320_v23 }
  0x94   : > { %523 = vrot.lane.b32.xlu1 %v338_v38, %s1511_s21  ;;  %507 = vrot.lane.b32.xlu0 %v318_v39, %s1511_s21 }
  0x96   : > { %v1832_v43 = vpop.permute.xlu1 %257  ;;  %v1834_v44 = vpop.permute.xlu0 %255 }
  0x98   : > { %571 = vrot.lane.b32.xlu1 %v1827_v40, %s1512_s24  ;;  %555 = vrot.lane.b32.xlu0 %v1830_v41, %s1512_s24 }
  0x9a   : > { %v1840_v45 = vpop.permute.xlu1 %273  ;;  %v1842_v47 = vpop.permute.xlu0 %271 }
  0x9c   : > { %370 = vrot.lane.b32.xlu1 %v338_v38, %s1508_s8  ;;  %354 = vrot.lane.b32.xlu0 %v318_v39, %s1508_s8 }
  0x9e   : > { %v1846_v48 = vpop.permute.xlu1 %360  ;;  %v1848_v49 = vpop.permute.xlu0 %344 }
  0xa0   : > { %418 = vrot.lane.b32.xlu1 %v1827_v40, %s1509_s17  ;;  %402 = vrot.lane.b32.xlu0 %v1830_v41, %s1509_s17 }
  0xa2   : > { %v1864_v61 = vpop.permute.xlu1 %362  ;;  %v1866_v62 = vpop.permute.xlu0 %346 }
  0xa4   : > { %573 = vrot.lane.b32.xlu1 %v1851_v51, %s1512_s24  ;;  %557 = vrot.lane.b32.xlu0 %v1854_v56, %s1512_s24 }
  0xa6   : > { %v1874_v3 = vpop.permute.xlu1 %410  ;;  %v1876_v4 = vpop.permute.xlu0 %394 }
  0xa8   : > { %625 = vrot.lane.b32.xlu1 %v252_v63, %s1513_s30  ;;  %609 = vrot.lane.b32.xlu0 %v232_v1, %s1513_s30 }
  0xaa   : > { %v1882_v8 = vpop.permute.xlu1 %412  ;;  %v1884_v9 = vpop.permute.xlu0 %396 }
  0xac   : > { %420 = vrot.lane.b32.xlu1 %v1851_v51, %s1509_s17  ;;  %404 = vrot.lane.b32.xlu0 %v1854_v56, %s1509_s17  ;;  %v1966_v51 = vld [vmem:[%s1609_s6 + $0xc8] sm:$0xff] }
  0xad   : > { %v444_v46 = vrot.slane %v1966_v51, 1 }
  0xae   : > { %v1890_v13 = vpop.permute.xlu1 %464  ;;  %v1892_v14 = vpop.permute.xlu0 %448 }
  0xb0   : > { %472 = vrot.lane.b32.xlu1 %v252_v63, %s1510_s18  ;;  %456 = vrot.lane.b32.xlu0 %v232_v1, %s1510_s18 }
  0xb2   : > { %v276_v25 = vpop.permute.xlu1 %275  ;;  %v260_v30 = vpop.permute.xlu0 %259 }
  0xb3   : > { %v717_v41 = vsel %vm706_vm2, %v1662_v26, %v276_v25  ;;  %v709_v40 = vsel %vm706_vm2, %v1665_v27, %v260_v30 }
  0xb4   : > { %627 = vrot.lane.b32.xlu1 %v254_v15, %s1513_s30  ;;  %611 = vrot.lane.b32.xlu0 %v234_v18, %s1513_s30 }
  0xb6   : > { %v1906_v33 = vpop.permute.xlu1 %466  ;;  %v1908_v35 = vpop.permute.xlu0 %450 }
  0xb8   : > { %678 = vrot.lane.b32.xlu1 %v341_v31, %s1514_s28  ;;  %662 = vrot.lane.b32.xlu0 %v321_v32, %s1514_s28 }
  0xba   : > { %v1912_v36 = vpop.permute.xlu1 %517  ;;  %v1914_v37 = vpop.permute.xlu0 %501 }
  0xbc   : > { %283 = vrot.lane.b32.xlu1 %v252_v63, %s1507_s7  ;;  %267 = vrot.lane.b32.xlu0 %v232_v1, %s1507_s7  ;;  %v343_v63 = vsel %vm303_vm1, %v340_v21, %v342_v57  ;;  %v323_v1 = vsel %vm303_vm1, %v320_v23, %v322_v58  ;;  %v1949_v57 = vld [vmem:[%s1609_s6 + $0xc0] sm:$0xff] }
  0xbd   : > { %v443_v50 = vrot.slane %v1949_v57, 1 }
  0xbe   : > { %v1918_v38 = vpop.permute.xlu1 %277  ;;  %v1920_v39 = vpop.permute.xlu0 %261 }
  0xc0   : > { %474 = vrot.lane.b32.xlu1 %v254_v15, %s1510_s18  ;;  %458 = vrot.lane.b32.xlu0 %v234_v18, %s1510_s18 }
  0xc2   : > { %v365_v59 = vpop.permute.xlu1 %364  ;;  %v349_v60 = vpop.permute.xlu0 %348 }
  0xc4   : > { %525 = vrot.lane.b32.xlu1 %v341_v31, %s1511_s21  ;;  %509 = vrot.lane.b32.xlu0 %v321_v32, %s1511_s21 }
  0xc6   : > { %v1928_v11 = vpop.permute.xlu1 %519  ;;  %v1930_v12 = vpop.permute.xlu0 %503 }
  0xc8   : > { %680 = vrot.lane.b32.xlu1 %v343_v63, %s1514_s28  ;;  %664 = vrot.lane.b32.xlu0 %v323_v1, %s1514_s28 }
  0xca   : > { %v1934_v5 = vpop.permute.xlu1 %567  ;;  %v1936_v7 = vpop.permute.xlu0 %551 }
  0xcc   : > { %285 = vrot.lane.b32.xlu1 %v254_v15, %s1507_s7  ;;  %269 = vrot.lane.b32.xlu0 %v234_v18, %s1507_s7 }
  0xce   : > { %v1940_v19 = vpop.permute.xlu1 %366  ;;  %v1942_v21 = vpop.permute.xlu0 %350 }
  0xd0   : > { %372 = vrot.lane.b32.xlu1 %v341_v31, %s1508_s8  ;;  %356 = vrot.lane.b32.xlu0 %v321_v32, %s1508_s8 }
  0xd2   : > { %v415_v22 = vpop.permute.xlu1 %414  ;;  %v399_v23 = vpop.permute.xlu0 %398 }
  0xd4   : > { %527 = vrot.lane.b32.xlu1 %v343_v63, %s1511_s21  ;;  %511 = vrot.lane.b32.xlu0 %v323_v1, %s1511_s21 }
  0xd6   : > { %v1951_v15 = vpop.permute.xlu1 %569  ;;  %v1953_v18 = vpop.permute.xlu0 %553 }
  0xd8   : > { %575 = vrot.lane.b32.xlu1 %v1949_v57, %s1512_s24  ;;  %559 = vrot.lane.b32.xlu0 %v1626_v10, %s1512_s24 }
  0xda   : > { %v622_v31 = vpop.permute.xlu1 %621  ;;  %v606_v32 = vpop.permute.xlu0 %605 }
  0xdc   : > { %374 = vrot.lane.b32.xlu1 %v343_v63, %s1508_s8  ;;  %358 = vrot.lane.b32.xlu0 %v323_v1, %s1508_s8  ;;  %v734_v63 = vsel %vm723_vm3, %v717_v41, %v365_v59  ;;  %v726_v1 = vsel %vm723_vm3, %v709_v40, %v349_v60  ;;  %v707_v40 = vsel %vm706_vm2, %v1616_v2, %v1834_v44 }
  0xdd   : > { %v751_v25 = vsel %vm740_vm4, %v734_v63, %v415_v22  ;;  %v743_v42 = vsel %vm740_vm4, %v726_v1, %v399_v23  ;;  %v715_v41 = vsel %vm706_vm2, %v1626_v10, %v1842_v47  ;;  %v445_v60 = vsel %vm214_vm0, %v443_v50, %v444_v46 }
  0xde   : > { %v1961_v58 = vpop.permute.xlu1 %416  ;;  %v1963_v56 = vpop.permute.xlu0 %400  ;;  %v732_v59 = vsel %vm723_vm3, %v715_v41, %v1846_v48  ;;  %v497_v41 = vrot.slane %v1966_v51, 2 }
  0xdf   : > { %v749_v2 = vsel %vm740_vm4, %v732_v59, %v1874_v3 }
  0xe0   : > { %422 = vrot.lane.b32.xlu1 %v1949_v57, %s1509_s17  ;;  %406 = vrot.lane.b32.xlu0 %v1626_v10, %s1509_s17  ;;  %v766_v22 = vsel %vm757_vm5, %v749_v2, %v1890_v13 }
  0xe1   : > { %v783_v50 = vsel %vm774_vm6, %v766_v22, %v1912_v36 }
  0xe2   : > { %v469_v27 = vpop.permute.xlu1 %468  ;;  %v453_v30 = vpop.permute.xlu0 %452  ;;  %v800_v3 = vsel %vm791_vm7, %v783_v50, %v1934_v5 }
  0xe3   : > { %v1983_v34 = vsel %vm757_vm5, %v751_v25, %v469_v27  ;;  %v1986_v55 = vsel %vm757_vm5, %v743_v42, %v453_v30  ;;  %v724_v42 = vsel %vm723_vm3, %v707_v40, %v1848_v49  ;;  %v817_v13 = vsel %vm808_vm8, %v800_v3, %v622_v31 }
  0xe4   : > { %577 = vrot.lane.b32.xlu1 %v1966_v51, %s1512_s24  ;;  %561 = vrot.lane.b32.xlu0 %v1621_v6, %s1512_s24  ;;  %v741_v10 = vsel %vm740_vm4, %v724_v42, %v1876_v4  ;;  %v710_v25 = vsel %vm706_vm2, %v1671_v29, %v1920_v39  ;;  %v496_v27 = vrot.slane %v1949_v57, 2 }
  0xe5   : > { %v758_v48 = vsel %vm757_vm5, %v741_v10, %v1892_v14  ;;  %v727_v40 = vsel %vm723_vm3, %v710_v25, %v1942_v21 }
  0xe6   : > { %v624_v44 = vpop.permute.xlu1 %623  ;;  %v608_v47 = vpop.permute.xlu0 %607  ;;  %v775_v49 = vsel %vm774_vm6, %v758_v48, %v1914_v37  ;;  %v186_v37 = vld [vmem:[%s1609_s6 + $0xd0] sm:$0x3]  ;;  %v744_v39 = vsel %vm740_vm4, %v727_v40, %v1963_v56 }
  0xe7   : > { %v792_v4 = vsel %vm791_vm7, %v775_v49, %v1936_v7  ;;  %v446_v5 = vrot.slane %v186_v37, 1 }
  0xe8   : > { %629 = vrot.lane.b32.xlu1 %v445_v60, %s1513_s30  ;;  %613 = vrot.lane.b32.xlu0 %v1639_v17, %s1513_s30  ;;  %v809_v14 = vsel %vm808_vm8, %v792_v4, %v606_v32  ;;  %v718_v32 = vsel %vm706_vm2, %v1668_v28, %v1918_v38 }
  0xe9   : > { %v735_v30 = vsel %vm723_vm3, %v718_v32, %v1940_v19  ;;  %v447_v38 = vsel %vm214_vm0, %v444_v46, %v446_v5  ;;  %v716_v46 = vsel %vm706_vm2, %v1621_v6, %v1840_v45 }
  0xea   : > { %v675_v36 = vpop.permute.xlu1 %674  ;;  %v659_v23 = vpop.permute.xlu0 %658  ;;  %v752_v29 = vsel %vm740_vm4, %v735_v30, %v1961_v58  ;;  %v498_v58 = vsel %vm303_vm1, %v496_v27, %v497_v41 }
  0xeb   : > { %v834_v63 = vsel %vm825_vm9, %v817_v13, %v675_v36  ;;  %v826_v1 = vsel %vm825_vm9, %v809_v14, %v659_v23  ;;  %v188_v14 = vld [vmem:[%s1609_s6 + $0xe0] sm:$0xff] }
  0xec   : > { %424 = vrot.lane.b32.xlu1 %v1966_v51, %s1509_s17  ;;  %1292 = vmatprep.mubr.msk.f32.mxu1 %vm851_vm10, %v834_v63  ;;  %v733_v51 = vsel %vm723_vm3, %v716_v46, %v1864_v61  ;;  %v601_v23 = vrot.slane %v188_v14, 1  ;;  %v2373_v63 = vld [vmem:[#allocation9_spill] sm:$0xff] }
  0xed   : > { %408 = vrot.lane.b32.xlu0 %v1621_v6, %s1509_s17  ;;  %1280 = vmatprep.mubr.msk.f32.mxu0 %vm851_vm10, %v826_v1 }
  0xee   : > { %v280_v7 = vpop.permute.xlu1 %279  ;;  %v264_v31 = vpop.permute.xlu0 %263 }
  0xef   : > { %v719_v22 = vsel %vm706_vm2, %v1729_v52, %v280_v7  ;;  %v187_v52 = vld [vmem:[%s1609_s6 + $0xd8] sm:$0xff] }
  0xf0   : > { %476 = vrot.lane.b32.xlu1 %v445_v60, %s1510_s18  ;;  %v600_v36 = vrot.slane %v187_v52, 1 }
  0xf1   : > { %460 = vrot.lane.b32.xlu0 %v1639_v17, %s1510_s18  ;;  %v708_v17 = vsel %vm706_vm2, %v1612_v0, %v1832_v43  ;;  %v750_v0 = vsel %vm740_vm4, %v733_v51, %v1882_v8 }
  0xf2   : > { %v471_v57 = vpop.permute.xlu1 %470  ;;  %v455_v59 = vpop.permute.xlu0 %454  ;;  %v725_v56 = vsel %vm723_vm3, %v708_v17, %v1866_v62  ;;  %v767_v61 = vsel %vm757_vm5, %v750_v0, %v1906_v33 }
  0xf3   : > { %v2054_v19 = vsel %vm757_vm5, %v752_v29, %v471_v57  ;;  %v2057_v21 = vsel %vm757_vm5, %v744_v39, %v455_v59  ;;  %v742_v43 = vsel %vm740_vm4, %v725_v56, %v1884_v9  ;;  %v784_v42 = vsel %vm774_vm6, %v767_v61, %v1928_v11  ;;  %v2374_v29 = vld [vmem:[#allocation5_spill] sm:$0xff]  ;;  %v2375_v59 = vld [vmem:[#allocation6_spill] sm:$0xff] }
  0xf4   : > { %631 = vrot.lane.b32.xlu1 %v447_v38, %s1513_s30  ;;  %v759_v62 = vsel %vm757_vm5, %v742_v43, %v1908_v35  ;;  %v801_v8 = vsel %vm791_vm7, %v784_v42, %v1951_v15  ;;  %v499_v15 = vrot.slane %v186_v37, 2 }
  0xf5   : > { %615 = vrot.lane.b32.xlu0 %v1636_v16, %s1513_s30  ;;  %v776_v60 = vsel %vm774_vm6, %v759_v62, %v1930_v12  ;;  %v818_v33 = vsel %vm808_vm8, %v801_v8, %v624_v44 }
  0xf6   : > { %v2077_v6 = vpop.permute.xlu1 %521  ;;  %v2079_v45 = vpop.permute.xlu0 %505  ;;  %v793_v9 = vsel %vm791_vm7, %v776_v60, %v1953_v18  ;;  %v2377_v60 = vld [vmem:[#allocation8_spill] sm:$0xff] }
  0xf7   : > { %v810_v35 = vsel %vm808_vm8, %v793_v9, %v608_v47  ;;  %v500_v47 = vsel %vm303_vm1, %v497_v41, %v499_v15  ;;  %v653_v41 = vrot.slane %v187_v52, 2 }
  0xf8   : > { %682 = vrot.lane.b32.xlu1 %v498_v58, %s1514_s28 }
  0xf9   : > { %666 = vrot.lane.b32.xlu0 %v1648_v20, %s1514_s28 }
  0xfa   : > { %v677_v2 = vpop.permute.xlu1 %676  ;;  %v661_v11 = vpop.permute.xlu0 %660 }
  0xfb   : > { %v835_v10 = vsel %vm825_vm9, %v818_v33, %v677_v2  ;;  %v827_v12 = vsel %vm825_vm9, %v810_v35, %v661_v11 }
  0xfc   : > { %478 = vrot.lane.b32.xlu1 %v447_v38, %s1510_s18  ;;  %1293 = vmatmul.mubr.msk.f32.vlgmr.msra.gmra.mrb[0].mxu1 %vm851_vm10, %v835_v10  ;;  %v654_v38 = vrot.slane %v188_v14, 2  ;;  %v785_v10 = vsel %vm774_vm6, %v1983_v34, %v2077_v6 }
  0xfd   : > { %462 = vrot.lane.b32.xlu0 %v1636_v16, %s1510_s18  ;;  %1281 = vmatmul.mubr.msk.f32.vlgmr.msra.gmra.mrb[0].mxu0 %vm851_vm10, %v827_v12  ;;  %v711_v16 = vsel %vm706_vm2, %v1732_v53, %v264_v31  ;;  %v777_v12 = vsel %vm774_vm6, %v1986_v55, %v2079_v45  ;;  %s1236_s18 = sshll.u32 %s1489_s12, 4 }
  0xfe   : > { %v282_v18 = vpop.permute.xlu1 %281  ;;  %v266_v44 = vpop.permute.xlu0 %265  ;;  %v655_v17 = vsel %vm303_vm1, %v653_v41, %v654_v38 }
  0xff   : > { %v720_v37 = vsel %vm706_vm2, %v1742_v54, %v282_v18  ;;  %v712_v1 = vsel %vm706_vm2, %v2373_v63, %v266_v44 }
 0x100   : > { %529 = vrot.lane.b32.xlu1 %v498_v58, %s1511_s21  ;;  %v2376_v58 = vld [vmem:[#allocation7_spill] sm:$0xff] }
 0x101   : > { %513 = vrot.lane.b32.xlu0 %v1648_v20, %s1511_s21 }
 0x102   : > { %v369_v48 = vpop.permute.xlu1 %368  ;;  %v353_v50 = vpop.permute.xlu0 %352 }
 0x103   : > { %v736_v49 = vsel %vm723_vm3, %v719_v22, %v369_v48  ;;  %v728_v3 = vsel %vm723_vm3, %v711_v16, %v353_v50 }
 0x104   : > { %684 = vrot.lane.b32.xlu1 %v500_v47, %s1514_s28 }
 0x105   : > { %668 = vrot.lane.b32.xlu0 %v1655_v24, %s1514_s28 }
 0x106   : > { %v2118_v20 = vpop.permute.xlu1 %523  ;;  %v2120_v4 = vpop.permute.xlu0 %507 }
 0x108   : > { %531 = vrot.lane.b32.xlu1 %v500_v47, %s1511_s21 }
 0x109   : > { %515 = vrot.lane.b32.xlu0 %v1655_v24, %s1511_s21  ;;  %v189_v24 = vld [vmem:[%s1609_s6 + $0xe8] sm:$0x3]  ;;  %s148_s6 = sand.u32 1, %s1481_s10   ;;  %s1232_s21 = sshll.u32 %s1493_s13, 5 }
 0x10a   : > { %v572_v53 = vpop.permute.xlu1 %571  ;;  %v556_v13 = vpop.permute.xlu0 %555  ;;  %v603_v25 = vrot.slane %v189_v24, 1  ;;  %v656_v46 = vrot.slane %v189_v24, 2  ;;  %s1209_s8 = sshll.u32 %s148_s6, 7  ;;  %s2297_s25 = scalar_lea.sflag [#allocation3], %s148_s6 }
 0x10b   : > { %v802_v15 = vsel %vm791_vm7, %v785_v10, %v572_v53  ;;  %v794_v18 = vsel %vm791_vm7, %v777_v12, %v556_v13  ;;  %v786_v13 = vsel %vm774_vm6, %v2054_v19, %v2118_v20  ;;  %v2378_v20 = vld [vmem:[#allocation10_spill] sm:$0xff]  ;;  %s2267_s17 = scalar_lea.vmem [#allocation2], %s1209_s8 }
 0x10c   : > { %579 = vrot.lane.b32.xlu1 %v187_v52, %s1512_s24  ;;  %v604_v39 = vsel %vm214_vm0, %v601_v23, %v603_v25  ;;  %v657_v0 = vsel %vm303_vm1, %v654_v38, %v656_v46  ;;  %s1126_s4 = sshll.u32 %s2267_s17, 4  ;;  %s2290_s4 = int_to_ptr.vmem [resolvable:$true] %s1126_s4 }
 0x10d   : > { %563 = vrot.lane.b32.xlu0 %v1662_v26, %s1512_s24  ;;  %v602_v26 = vsel %vm214_vm0, %v600_v36, %v601_v23  ;;  %s1411_s26 = scalar_lea.vmem %s2290_s4, 2048 }
 0x10e   : > { %v371_v5 = vpop.permute.xlu1 %370  ;;  %v355_v7 = vpop.permute.xlu0 %354  ;;  %p1412_p13 = scmp.ne.s32.totalorder %s2290_s4, %s1411_s26 }
 0x10f   : > { %v737_v31 = vsel %vm723_vm3, %v720_v37, %v371_v5  ;;  %v729_v32 = vsel %vm723_vm3, %v712_v1, %v355_v7 }
 0x110   : > { %581 = vrot.lane.b32.xlu1 %v188_v14, %s1512_s24  ;;  %v778_v14 = vsel %vm774_vm6, %v2057_v21, %v2120_v4  ;;  %p1413_p0 = pnand %p1412_p13, %p1583_p3 }
 0x111   : > { %565 = vrot.lane.b32.xlu0 %v1668_v28, %s1512_s24  ;;  %s1123_s24 = sadd.s32 %s1236_s18, %s1232_s21 }
 0x112   : > { %v419_v27 = vpop.permute.xlu1 %418  ;;  %v403_v54 = vpop.permute.xlu0 %402  ;;  %p1414_p1 = pneg %p1413_p0 }
 0x113   : > { %v753_v30 = vsel %vm740_vm4, %v736_v49, %v419_v27  ;;  %v745_v40 = vsel %vm740_vm4, %v728_v3, %v403_v54 }
 0x114   : > { %633 = vrot.lane.b32.xlu1 %v602_v26, %s1513_s30 }
 0x115   : > { %617 = vrot.lane.b32.xlu0 %v2374_v29, %s1513_s30 }
 0x116   : > { %v574_v57 = vpop.permute.xlu1 %573  ;;  %v558_v28 = vpop.permute.xlu0 %557 }
 0x117   : > { %v803_v36 = vsel %vm791_vm7, %v786_v13, %v574_v57  ;;  %v795_v23 = vsel %vm791_vm7, %v778_v14, %v558_v28 }
 0x118   : > { %635 = vrot.lane.b32.xlu1 %v604_v39, %s1513_s30 }
 0x119   : > { %619 = vrot.lane.b32.xlu0 %v2375_v59, %s1513_s30  ;;  %s1233_s30 = sshll.u32 %s1123_s24, 7 }
 0x11a   : > { %v626_v51 = vpop.permute.xlu1 %625  ;;  %v610_v56 = vpop.permute.xlu0 %609  ;;  %s2287_s5 = scalar_lea.hbm %s2352_s2, %s1233_s30 }
 0x11b   : > { %v819_v44 = vsel %vm808_vm8, %v802_v15, %v626_v51  ;;  %v811_v47 = vsel %vm808_vm8, %v794_v18, %v610_v56 }
 0x11c   : > { %686 = vrot.lane.b32.xlu1 %v655_v17, %s1514_s28 }
 0x11d   : > { %670 = vrot.lane.b32.xlu0 %v2376_v58, %s1514_s28 }
 0x11e   : > { %v421_v43 = vpop.permute.xlu1 %420  ;;  %v405_v61 = vpop.permute.xlu0 %404 }
 0x11f   : > { %v754_v62 = vsel %vm740_vm4, %v737_v31, %v421_v43  ;;  %v746_v42 = vsel %vm740_vm4, %v729_v32, %v405_v61  ;;  %v2379_v31 = vld [vmem:[#allocation11_spill] sm:$0xff] }
 0x120   : > { %688 = vrot.lane.b32.xlu1 %v657_v0, %s1514_s28 }
 0x121   : > { %672 = vrot.lane.b32.xlu0 %v2377_v60, %s1514_s28  ;;  %s1515_s28 = smov [#allocation2]  }
 0x122   : > { %v473_v8 = vpop.permute.xlu1 %472  ;;  %v457_v9 = vpop.permute.xlu0 %456  ;;  %s1415_s29 = sshll.u32 %s1515_s28, 4  ;;  %s1416_s29 = int_to_ptr.vmem [resolvable:$false] %s1415_s29 }
 0x123   : > { %v2161_v33 = vsel %vm757_vm5, %v753_v30, %v473_v8  ;;  %v2164_v35 = vsel %vm757_vm5, %v745_v40, %v457_v9  ;;  %s1417_s3 = scalar_lea.vmem %s1416_s29, 4096  ;;  %p1418_p2 = scmp.lt.s32.totalorder %s2290_s4, %s1416_s29 }
 0x124   : > { %p1419_p4 = scmp.lt.s32.totalorder %s1417_s3, %s1411_s26 }
 0x126   : > { %v628_v2 = vpop.permute.xlu1 %627  ;;  %v612_v11 = vpop.permute.xlu0 %611  ;;  %p1420_p5 = por %p1419_p4, %p1418_p2 }
 0x127   : > { %v820_v37 = vsel %vm808_vm8, %v803_v36, %v628_v2  ;;  %v812_v63 = vsel %vm808_vm8, %v795_v23, %v612_v11 }
 0x128   : > { %p1421_p6 = pnand %p1420_p5, %p1414_p1 }
 0x12a   : > { %v679_v22 = vpop.permute.xlu1 %678  ;;  %v663_v16 = vpop.permute.xlu0 %662 }
 0x12b   : > { %v836_v48 = vsel %vm825_vm9, %v819_v44, %v679_v22  ;;  %v828_v50 = vsel %vm825_vm9, %v811_v47, %v663_v16 }
 0x12c   : > { %1283 = vmatprep.mubr.msk.f32.mxu0 %vm851_vm10, %v828_v50  ;;  %1295 = vmatprep.mubr.msk.f32.mxu1 %vm851_vm10, %v836_v48 }
 0x12e   : > { %v284_v34 = vpop.permute.xlu1 %283  ;;  %v268_v55 = vpop.permute.xlu0 %267 }
 0x12f   : > { %v721_v4 = vsel %vm706_vm2, %v2378_v20, %v284_v34  ;;  %v713_v32 = vsel %vm706_vm2, %v2379_v31, %v268_v55 }
 0x132   : > { %v475_v6 = vpop.permute.xlu1 %474  ;;  %v459_v45 = vpop.permute.xlu0 %458 }
 0x133   : > { %v771_v49 = vsel %vm757_vm5, %v754_v62, %v475_v6  ;;  %v763_v3 = vsel %vm757_vm5, %v746_v42, %v459_v45 }
 0x136   : > { %v526_v52 = vpop.permute.xlu1 %525  ;;  %v510_v53 = vpop.permute.xlu0 %509 }
 0x137   : > { %v787_v42 = vsel %vm774_vm6, %v2161_v33, %v526_v52  ;;  %v779_v60 = vsel %vm774_vm6, %v2164_v35, %v510_v53 }
 0x13a   : > { %v681_v1 = vpop.permute.xlu1 %680  ;;  %v665_v5 = vpop.permute.xlu0 %664 }
 0x13b   : > { %v837_v7 = vsel %vm825_vm9, %v820_v37, %v681_v1  ;;  %v829_v24 = vsel %vm825_vm9, %v812_v63, %v665_v5 }
 0x13c   : > { %1284 = vmatmul.mubr.msk.f32.gmra.mrb[2].mxu0 %vm851_vm10, %v829_v24  ;;  %1296 = vmatmul.mubr.msk.f32.gmra.mrb[2].mxu1 %vm851_vm10, %v837_v7 }
 0x13e   : > { %v2196_v19 = vpop.permute.xlu1 %285  ;;  %v2198_v21 = vpop.permute.xlu0 %269 }
 0x142   : > { %v373_v26 = vpop.permute.xlu1 %372  ;;  %v357_v25 = vpop.permute.xlu0 %356 }
 0x143   : > { %v738_v27 = vsel %vm723_vm3, %v721_v4, %v373_v26  ;;  %v730_v54 = vsel %vm723_vm3, %v713_v32, %v357_v25  ;;  %v2380_v4 = vld [vmem:[#allocation12_spill] sm:$0xff]  ;;  %v2381_v25 = vld [vmem:[#allocation13_spill] sm:$0xff] }
 0x144   : > { %v722_v31 = vsel %vm706_vm2, %v2380_v4, %v2196_v19 }
 0x146   : > { %v528_v30 = vpop.permute.xlu1 %527  ;;  %v512_v40 = vpop.permute.xlu0 %511 }
 0x147   : > { %v788_v22 = vsel %vm774_vm6, %v771_v49, %v528_v30  ;;  %v780_v16 = vsel %vm774_vm6, %v763_v3, %v512_v40  ;;  %v714_v30 = vsel %vm706_vm2, %v2381_v25, %v2198_v21 }
 0x14a   : > { %v576_v41 = vpop.permute.xlu1 %575  ;;  %v560_v38 = vpop.permute.xlu0 %559 }
 0x14b   : > { %v804_v8 = vsel %vm791_vm7, %v787_v42, %v576_v41  ;;  %v796_v9 = vsel %vm791_vm7, %v779_v60, %v560_v38 }
 0x14e   : > { %v375_v29 = vpop.permute.xlu1 %374  ;;  %v359_v39 = vpop.permute.xlu0 %358 }
 0x14f   : > { %v731_v41 = vsel %vm723_vm3, %v714_v30, %v359_v39 }
 0x152   : > { %v423_v57 = vpop.permute.xlu1 %422  ;;  %v407_v28 = vpop.permute.xlu0 %406 }
 0x153   : > { %v755_v1 = vsel %vm740_vm4, %v738_v27, %v423_v57  ;;  %v747_v7 = vsel %vm740_vm4, %v730_v54, %v407_v28  ;;  %v739_v27 = vsel %vm723_vm3, %v722_v31, %v375_v29 }
 0x156   : > { %v578_v59 = vpop.permute.xlu1 %577  ;;  %v562_v17 = vpop.permute.xlu0 %561 }
 0x157   : > { %v805_v48 = vsel %vm791_vm7, %v788_v22, %v578_v59  ;;  %v797_v50 = vsel %vm791_vm7, %v780_v16, %v562_v17 }
 0x15a   : > { %v630_v46 = vpop.permute.xlu1 %629  ;;  %v614_v51 = vpop.permute.xlu0 %613 }
 0x15b   : > { %v821_v2 = vsel %vm808_vm8, %v804_v8, %v630_v46  ;;  %v813_v10 = vsel %vm808_vm8, %v796_v9, %v614_v51 }
 0x15e   : > { %v425_v56 = vpop.permute.xlu1 %424 }
 0x15f   : > { %v409_v58 = vpop.permute.xlu0 %408  ;;  %v756_v38 = vsel %vm740_vm4, %v739_v27, %v425_v56 }
 0x160   : > { %v748_v59 = vsel %vm740_vm4, %v731_v41, %v409_v58 }
 0x162   : > { %v477_v0 = vpop.permute.xlu1 %476 }
 0x163   : > { %v461_v43 = vpop.permute.xlu0 %460  ;;  %v772_v24 = vsel %vm757_vm5, %v755_v1, %v477_v0 }
 0x164   : > { %v764_v32 = vsel %vm757_vm5, %v747_v7, %v461_v43 }
 0x166   : > { %v632_v61 = vpop.permute.xlu1 %631 }
 0x167   : > { %v616_v62 = vpop.permute.xlu0 %615  ;;  %v822_v34 = vsel %vm808_vm8, %v805_v48, %v632_v61 }
 0x168   : > { %v814_v6 = vsel %vm808_vm8, %v797_v50, %v616_v62 }
 0x16a   : > { %v683_v11 = vpop.permute.xlu1 %682 }
 0x16b   : > { %v838_v12 = vsel %vm825_vm9, %v821_v2, %v683_v11  ;;  %v667_v15 = vpop.permute.xlu0 %666 }
 0x16c   : > { %v830_v18 = vsel %vm825_vm9, %v813_v10, %v667_v15  ;;  %1298 = vmatprep.mubr.msk.f32.mxu1 %vm851_vm10, %v838_v12 }
 0x16d   : > { %1286 = vmatprep.mubr.msk.f32.mxu0 %vm851_vm10, %v830_v18 }
 0x16e   : > { %v479_v33 = vpop.permute.xlu1 %478 }
 0x16f   : > { %v463_v35 = vpop.permute.xlu0 %462  ;;  %v773_v17 = vsel %vm757_vm5, %v756_v38, %v479_v33 }
 0x170   : > { %v765_v51 = vsel %vm757_vm5, %v748_v59, %v463_v35 }
 0x172   : > { %v530_v44 = vpop.permute.xlu1 %529 }
 0x173   : > { %v514_v47 = vpop.permute.xlu0 %513  ;;  %v789_v26 = vsel %vm774_vm6, %v772_v24, %v530_v44 }
 0x174   : > { %v781_v40 = vsel %vm774_vm6, %v764_v32, %v514_v47 }
 0x176   : > { %v685_v55 = vpop.permute.xlu1 %684 }
 0x177   : > { %v839_v45 = vsel %vm825_vm9, %v822_v34, %v685_v55  ;;  %v669_v52 = vpop.permute.xlu0 %668 }
 0x178   : > { %v831_v53 = vsel %vm825_vm9, %v814_v6, %v669_v52  ;;  %1299 = vmatmul.mubr.msk.f32.gmra.mrb[4].mxu1 %vm851_vm10, %v839_v45 }
 0x179   : > { %1287 = vmatmul.mubr.msk.f32.gmra.mrb[4].mxu0 %vm851_vm10, %v831_v53 }
 0x17a   : > { %v532_v49 = vpop.permute.xlu1 %531 }
 0x17b   : > { %v516_v3 = vpop.permute.xlu0 %515  ;;  %v790_v39 = vsel %vm774_vm6, %v773_v17, %v532_v49 }
 0x17c   : > { %v782_v0 = vsel %vm774_vm6, %v765_v51, %v516_v3 }
 0x17e   : > { %v580_v13 = vpop.permute.xlu1 %579 }
 0x17f   : > { %v564_v14 = vpop.permute.xlu0 %563  ;;  %v806_v54 = vsel %vm791_vm7, %v789_v26, %v580_v13 }
 0x180   : > { %v798_v19 = vsel %vm791_vm7, %v781_v40, %v564_v14 }
 0x182   : > { %v582_v36 = vpop.permute.xlu1 %581 }
 0x183   : > { %v566_v23 = vpop.permute.xlu0 %565  ;;  %v807_v58 = vsel %vm791_vm7, %v790_v39, %v582_v36 }
 0x184   : > { %v799_v43 = vsel %vm791_vm7, %v782_v0, %v566_v23 }
 0x186   : > { %v634_v37 = vpop.permute.xlu1 %633 }
 0x187   : > { %v618_v63 = vpop.permute.xlu0 %617  ;;  %v823_v57 = vsel %vm808_vm8, %v806_v54, %v634_v37 }
 0x188   : > { %v815_v21 = vsel %vm808_vm8, %v798_v19, %v618_v63 }
 0x18a   : > { %v636_v5 = vpop.permute.xlu1 %635 }
 0x18b   : > { %v620_v20 = vpop.permute.xlu0 %619  ;;  %v824_v61 = vsel %vm808_vm8, %v807_v58, %v636_v5 }
 0x18c   : > { %v816_v42 = vsel %vm808_vm8, %v799_v43, %v620_v20 }
 0x18e   : > { %v687_v28 = vpop.permute.xlu1 %686 }
 0x18f   : > { %v840_v29 = vsel %vm825_vm9, %v823_v57, %v687_v28  ;;  %v671_v46 = vpop.permute.xlu0 %670 }
 0x190   : > { %v832_v56 = vsel %vm825_vm9, %v815_v21, %v671_v46  ;;  %1301 = vmatprep.mubr.msk.f32.mxu1 %vm851_vm10, %v840_v29 }
 0x191   : > { %1289 = vmatprep.mubr.msk.f32.mxu0 %vm851_vm10, %v832_v56 }
 0x192   : > { %v689_v62 = vpop.permute.xlu1 %688 }
 0x193   : > { %v841_v60 = vsel %vm825_vm9, %v824_v61, %v689_v62  ;;  %v673_v8 = vpop.permute.xlu0 %672 }
 0x194   : > { %v833_v9 = vsel %vm825_vm9, %v816_v42, %v673_v8  ;;  %1302 = vmatmul.mubr.msk.f32.gmra.mrb[6].mxu1 %vm851_vm10, %v841_v60 }
 0x195   : > { %1290 = vmatmul.mubr.msk.f32.gmra.mrb[6].mxu0 %vm851_vm10, %v833_v9 }
 0x1cf   : > { %v1294_v2 = vpop.f32.mrb[0].mxu1 }
 0x1d0   : > { %v1282_v11 = vpop.f32.mrb[0].mxu0  ;;  %vm1054_vm11 = vcmp.gt.f32.partialorder %v1294_v2, 0.0  ;;  %v1070_v10 = vmul.f32 0.2, %v1294_v2  ;;  %v1006_v12 = vpop.f32.mrb[1].mxu1 }
 0x1d1   : > { %vm1046_vm12 = vcmp.gt.f32.partialorder %v1282_v11, 0.0  ;;  %v1062_v15 = vmul.f32 0.2, %v1282_v11  ;;  %v966_v18 = vpop.f32.mrb[1].mxu0  ;;  %vm1053_vm13 = vcmp.gt.f32.partialorder %v1006_v12, 0.0 }
 0x1d2   : > { %v1086_v33 = vsel %vm1054_vm11, %v1294_v2, %v1070_v10  ;;  %vm1045_vm14 = vcmp.gt.f32.partialorder %v966_v18, 0.0  ;;  %v1061_v35 = vmul.f32 0.2, %v966_v18  ;;  %v1069_v44 = vmul.f32 0.2, %v1006_v12 }
 0x1d3   : > { %v1078_v47 = vsel %vm1046_vm12, %v1282_v11, %v1062_v15  ;;  %1102 = vst [vmem:[%s2267_s17 + $0x48] sm:$0xff] %v1086_v33 }
 0x1d4   : > { %1094 = vst [vmem:[%s2267_s17 + $0x8] sm:$0xff] %v1078_v47  ;;  %v1077_v22 = vsel %vm1045_vm14, %v966_v18, %v1061_v35  ;;  %v1085_v16 = vsel %vm1053_vm13, %v1006_v12, %v1069_v44 }
 0x1d5   : > { %1093 = vst [vmem:[%s2267_s17] sm:$0xff] %v1077_v22  ;;  %1101 = vst [vmem:[%s2267_s17 + $0x40] sm:$0xff] %v1085_v16 }
 0x20f   : > { %v1285_v48 = vpop.f32.mrb[2].mxu0  ;;  %v1297_v50 = vpop.f32.mrb[2].mxu1 }
 0x210   : > { %vm1048_vm15 = vcmp.gt.f32.partialorder %v1285_v48, 0.0  ;;  %v1064_v34 = vmul.f32 0.2, %v1285_v48  ;;  %vm1056_vm0 = vcmp.gt.f32.partialorder %v1297_v50, 0.0  ;;  %v1072_v55 = vmul.f32 0.2, %v1297_v50 }
 0x211   : > { %v976_v6 = vpop.f32.mrb[3].mxu0  ;;  %v1016_v45 = vpop.f32.mrb[3].mxu1 }
 0x212   : > { %v1080_v52 = vsel %vm1048_vm15, %v1285_v48, %v1064_v34  ;;  %v1088_v53 = vsel %vm1056_vm0, %v1297_v50, %v1072_v55  ;;  %vm1047_vm1 = vcmp.gt.f32.partialorder %v976_v6, 0.0  ;;  %v1063_v49 = vmul.f32 0.2, %v976_v6 }
 0x213   : > { %1096 = vst [vmem:[%s2267_s17 + $0x18] sm:$0xff] %v1080_v52  ;;  %1104 = vst [vmem:[%s2267_s17 + $0x58] sm:$0xff] %v1088_v53  ;;  %vm1055_vm2 = vcmp.gt.f32.partialorder %v1016_v45, 0.0  ;;  %v1071_v3 = vmul.f32 0.2, %v1016_v45 }
 0x214   : > { %v1079_v13 = vsel %vm1047_vm1, %v976_v6, %v1063_v49 }
 0x215   : > { %1095 = vst [vmem:[%s2267_s17 + $0x10] sm:$0xff] %v1079_v13  ;;  %v1087_v14 = vsel %vm1055_vm2, %v1016_v45, %v1071_v3 }
 0x216   : > { %1103 = vst [vmem:[%s2267_s17 + $0x50] sm:$0xff] %v1087_v14 }
 0x24b   : > { %v1300_v36 = vpop.f32.mrb[4].mxu1 }
 0x24c   : > { %v1288_v23 = vpop.f32.mrb[4].mxu0  ;;  %vm1058_vm3 = vcmp.gt.f32.partialorder %v1300_v36, 0.0  ;;  %v1074_v37 = vmul.f32 0.2, %v1300_v36  ;;  %v1026_v63 = vpop.f32.mrb[5].mxu1 }
 0x24d   : > { %vm1050_vm4 = vcmp.gt.f32.partialorder %v1288_v23, 0.0  ;;  %v1066_v1 = vmul.f32 0.2, %v1288_v23  ;;  %v986_v5 = vpop.f32.mrb[5].mxu0  ;;  %vm1057_vm5 = vcmp.gt.f32.partialorder %v1026_v63, 0.0 }
 0x24e   : > { %v1090_v7 = vsel %vm1058_vm3, %v1300_v36, %v1074_v37  ;;  %vm1049_vm6 = vcmp.gt.f32.partialorder %v986_v5, 0.0  ;;  %v1065_v24 = vmul.f32 0.2, %v986_v5  ;;  %v1073_v20 = vmul.f32 0.2, %v1026_v63 }
 0x24f   : > { %v1082_v4 = vsel %vm1050_vm4, %v1288_v23, %v1066_v1  ;;  %1106 = vst [vmem:[%s2267_s17 + $0x68] sm:$0xff] %v1090_v7 }
 0x250   : > { %1098 = vst [vmem:[%s2267_s17 + $0x28] sm:$0xff] %v1082_v4  ;;  %v1081_v31 = vsel %vm1049_vm6, %v986_v5, %v1065_v24  ;;  %v1089_v32 = vsel %vm1057_vm5, %v1026_v63, %v1073_v20 }
 0x251   : > { %1097 = vst [vmem:[%s2267_s17 + $0x20] sm:$0xff] %v1081_v31  ;;  %1105 = vst [vmem:[%s2267_s17 + $0x60] sm:$0xff] %v1089_v32 }
 0x267   : > { %v1303_v26 = vpop.f32.mrb[6].mxu1 }
 0x268   : > { %v1291_v25 = vpop.f32.mrb[6].mxu0  ;;  %vm1060_vm7 = vcmp.gt.f32.partialorder %v1303_v26, 0.0  ;;  %v1076_v30 = vmul.f32 0.2, %v1303_v26  ;;  %v1036_v27 = vpop.f32.mrb[7].mxu1 }
 0x269   : > { %vm1052_vm8 = vcmp.gt.f32.partialorder %v1291_v25, 0.0  ;;  %v1068_v40 = vmul.f32 0.2, %v1291_v25  ;;  %v996_v54 = vpop.f32.mrb[7].mxu0  ;;  %vm1059_vm9 = vcmp.gt.f32.partialorder %v1036_v27, 0.0 }
 0x26a   : > { %v1092_v41 = vsel %vm1060_vm7, %v1303_v26, %v1076_v30  ;;  %vm1051_vm10 = vcmp.gt.f32.partialorder %v996_v54, 0.0  ;;  %v1067_v38 = vmul.f32 0.2, %v996_v54  ;;  %v1075_v19 = vmul.f32 0.2, %v1036_v27 }
 0x26b   : > { %v1084_v57 = vsel %vm1052_vm8, %v1291_v25, %v1068_v40  ;;  %1108 = vst [vmem:[%s2267_s17 + $0x78] sm:$0xff] %v1092_v41 }
 0x26c   : > { %1100 = vst [vmem:[%s2267_s17 + $0x38] sm:$0xff] %v1084_v57  ;;  %v1083_v28 = vsel %vm1051_vm10, %v996_v54, %v1067_v38  ;;  %v1091_v59 = vsel %vm1059_vm9, %v1036_v27, %v1075_v19 }
 0x26d   : > { %1099 = vst [vmem:[%s2267_s17 + $0x30] sm:$0xff] %v1083_v28  ;;  %1107 = vst [vmem:[%s2267_s17 + $0x70] sm:$0xff] %v1091_v59 }
 0x26e   : > { %1424 = shalt.err (!%p1421_p6)
}
 0x26f   : > { %s1425_s6 = scalar_lea.hbm %s2287_s5, 2048  ;;  %s1429_s18 = scalar_lea.hbm %s2352_s2, 8192 }
 0x270   : > { %p1426_p7 = scmp.ne.s32.totalorder %s2287_s5, %s1425_s6  ;;  %p1430_p11 = scmp.lt.u32.totalorder %s2287_s5, %s2352_s2 }
 0x271   : > { %p1431_p12 = scmp.lt.u32.totalorder %s1429_s18, %s1425_s6  ;;  %p1433_p0 = scmp.lt.u32.totalorder %s1425_s6, %s2287_s5 }
 0x272   : > { %p1427_p9 = pnand %p1426_p7, %p1583_p3 }
 0x273   : > { %p1432_p13 = por %p1431_p12, %p1430_p11 }
 0x274   : > { %p1428_p10 = pneg %p1427_p9 }
 0x275   : > { %p1434_p1 = por %p1433_p0, %p1432_p13 }
 0x277   : > { %p1435_p2 = pnand %p1434_p1, %p1428_p10 }
 0x279   : > { %1438 = shalt.err (!%p1435_p2)
}
 0x27a   : > { %s1516_s30 = smov 128  }
 0x27b   : > { %1331 = dma.vmem_to_hbm [thread:$0]  (%p1583_p3), %s2290_s4, 2048, %s2287_s5, %s2297_s25, %s1516_s30, %s1516_s30, %s1507_s7  }
 0x27c PF: > { %p1337_p4 = scmp.ge.s32.totalorder %s1505_s16, 2  ;;  %s1141_s12 = sand.u32 1, %s1477_s9  }
 0x27d   : > { %s1142_s13 = scalar_lea.sflag [#allocation3], %s1141_s12 }
 0x27e   : > { %p1334_p5 = pnand %p1337_p4, %p1592_p8 }
 0x280   : > { %1472 = dma.done.wait (!%p1334_p5), %s1142_s13, 2048  }
 0x281   : > { %1474 = vsyncadd (!%p1334_p5), %s1142_s13, 4294965248  ;;  %s15_s16 = sadd.s32 1, %s1505_s16   ;;  %s2382_s9 = smov %s1481_s10 }
 0x282   : > { %p12_p6 = scmp.ge.s32.totalorder %s15_s16, 6   ;;  %s2383_s10 = smov %s1485_s11 }
 0x283   : > { %s2384_s11 = smov %s1601_s27  ;;  %s2385_s12 = smov %s1497_s14 }
 0x284   : > { %s2386_s13 = smov %s1501_s15  ;;  %s2387_s14 = smov %s2390_s19 }
 0x285   : > { %s2388_s15 = smov %s2394_s20  ;;  %14 = sbr.rel (!%p12_p6) target bundleno = 5 (0x5), region = 64 }
 0x28c   :  { %1147 = vsyncpa [#allocation3], 1 }
 0x28d   :  { %1149 = vsyncpa [#allocation3 + $0x1], 1 }

</bundles_post_ra>
